<compile_context>
chip_gen: v7x
topology: tpu7x:2x2x1
jax: 0.10.0
libtpu: 0.0.40
codegen_flags: <defaults>
</compile_context>

<pallas_src>
import functools

import jax
import jax.numpy as jnp
from jax.experimental import pallas as pl
from jax.experimental.pallas import tpu as pltpu


def _round_up(x, m):
    return ((x + m - 1) // m) * m


def _vmem_capacity_bytes():
    """Per-core VMEM capacity; fall back to 64 MiB (v7x, smallest) if the query fails."""
    try:
        cap = getattr(pltpu.get_tpu_info(), "vmem_capacity_bytes", None)
        if cap:
            return int(cap)
    except Exception:
        pass
    return 64 << 20


# -----------------------------------------------------------------------------
# Path A: whole (M, N, D) per batch slab, grid over batch (preferred).
# -----------------------------------------------------------------------------
def _batch_kernel(path_ref, x_ref, o_ref, *, normalize):
    p = path_ref[...].astype(jnp.float32)                  # (Bt, M, N)
    x = x_ref[...].astype(jnp.float32)                     # (Bt, N, D)
    agg = jnp.einsum("bmn,bnd->bmd", p, x,
                     preferred_element_type=jnp.float32)   # MXU batched matmul
    if normalize:
        deg = jnp.sum(p, axis=2, keepdims=True)            # XLU lane-sum (slack slot)
        inv = 1.0 / deg                                     # inf exactly where deg == 0
        inv = jnp.where(jnp.isinf(inv), 0.0, inv)           # mirrors torch isinf -> 0
        agg = inv * agg
    o_ref[...] = agg.astype(o_ref.dtype)


def _batch_footprint(bb, M, N, D, path_itemsize):
    path_t = bb * M * N * path_itemsize
    x_t = bb * N * D * 4
    out_t = bb * M * D * 4
    # BlockSpec double-buffers every array; ~2 extra out-sized f32 temporaries
    # (einsum result, inv*agg product) also live in VMEM.
    return 2 * (path_t + x_t + out_t) + 2 * out_t


def _choose_block_b(B, M, N, D, path_itemsize, budget):
    divisors = [d for d in range(1, B + 1) if B % d == 0]
    # Prefer >= 4 grid steps (>= 2 pipelined steps per v7x TensorCore), then relax.
    for min_steps in (4, 2, 1):
        fits = [d for d in divisors
                if _batch_footprint(d, M, N, D, path_itemsize) <= budget
                and (B // d) >= min_steps]
        if fits:
            return max(fits)
    return None   # even a single batch element overflows -> tiled fallback


# -----------------------------------------------------------------------------
# Path B fallback: tile M (rows) and N (reduction, last grid axis) per batch.
# -----------------------------------------------------------------------------
def _tiled_kernel(path_ref, x_ref, o_ref, acc_ref, deg_ref, *, normalize):
    k = pl.program_id(2)

    @pl.when(k == 0)
    def _():
        acc_ref[...] = jnp.zeros_like(acc_ref)
        deg_ref[...] = jnp.zeros_like(deg_ref)

    p = path_ref[0].astype(jnp.float32)                     # (tm, tk)
    x = x_ref[0].astype(jnp.float32)                        # (tk, D)
    acc_ref[...] += jnp.dot(p, x, preferred_element_type=jnp.float32)
    if normalize:
        deg_ref[...] += jnp.sum(p, axis=1, keepdims=True)

    @pl.when(k == pl.num_programs(2) - 1)
    def _():
        acc = acc_ref[...]
        if normalize:
            inv = 1.0 / deg_ref[...]
            inv = jnp.where(jnp.isinf(inv), 0.0, inv)
            acc = inv * acc
        o_ref[0] = acc.astype(o_ref.dtype)


def _choose_tiles(M, N, D, path_itemsize, budget):
    tm_opts = sorted({min(t, _round_up(M, 8)) for t in (512, 256, 128, 64, 32, 16, 8)},
                     reverse=True)
    tk_opts = sorted({min(t, _round_up(N, 128)) for t in (2048, 1024, 512, 256, 128)},
                     reverse=True)
    for tm in tm_opts:
        for tk in tk_opts:
            fp = (2 * (tm * tk * path_itemsize + tk * D * 4 + tm * D * 4)   # dbl-buffered tiles
                  + tm * D * 4 + tm * 128 * 4                               # acc + deg scratch
                  + 2 * tm * D * 4)                                         # f32 temporaries
            if fp <= budget:
                return tm, tk
    # TODO(synk): also tile D (lane axis) if even the smallest (tm, tk) overflows.
    return tm_opts[-1], tk_opts[-1]


# -----------------------------------------------------------------------------
# Wrapper
# -----------------------------------------------------------------------------
def message_agg(X, path, agg_method="mean", *, path_dtype=None):
    """Pallas MessageAgg forward.  X: (B, N, D), path: (B, M, N) -> (B, M, D) f32."""
    B, N, D = X.shape
    Bp, M, Nn = path.shape
    assert (Bp, Nn) == (B, N)
    normalize = agg_method == "mean"

    if path_dtype is not None and path.dtype != path_dtype:
        # e.g. bf16: exact for 0/1 incidence matrices, halves path HBM/VMEM traffic.
        path = path.astype(path_dtype)
    X = X.astype(jnp.float32)

    cap = _vmem_capacity_bytes()
    vmem_limit = min(int(cap * 3 // 4), 100 << 20)   # raise scoped limit, keep headroom
    budget = int(cap * 2 // 5)                       # ~25 MiB on v7x, ~51 MiB on v5e/v6e

    path_isz = jnp.dtype(path.dtype).itemsize
    block_b = _choose_block_b(B, M, N, D, path_isz, budget)

    if block_b is not None:
        # ---- Path A: batch-tiled, full (M, N, D) per step (no padding needed). ----
        grid = (B // block_b,)
        return pl.pallas_call(
            functools.partial(_batch_kernel, normalize=normalize),
            out_shape=jax.ShapeDtypeStruct((B, M, D), jnp.float32),
            grid_spec=pltpu.PrefetchScalarGridSpec(
                num_scalar_prefetch=0,
                grid=grid,
                in_specs=[
                    pl.BlockSpec((block_b, M, N), lambda i: (i, 0, 0)),
                    pl.BlockSpec((block_b, N, D), lambda i: (i, 0, 0)),
                ],
                out_specs=pl.BlockSpec((block_b, M, D), lambda i: (i, 0, 0)),
            ),
            compiler_params=pltpu.CompilerParams(
                dimension_semantics=("parallel",),
                vmem_limit_bytes=vmem_limit),
        )(path, X)

    # ---- Path B: single batch element overflows VMEM -> tile M and the N reduction. ----
    tm, tk = _choose_tiles(M, N, D, path_isz, budget)
    Mp, Np = _round_up(M, tm), _round_up(N, tk)
    if (Mp, Np) != (M, N):
        # Zero padding is exact: zero rows/cols contribute nothing to agg or deg.
        path = jnp.pad(path, ((0, 0), (0, Mp - M), (0, Np - N)))
        X = jnp.pad(X, ((0, 0), (0, Np - N), (0, 0)))
    grid = (B, Mp // tm, Np // tk)

    out = pl.pallas_call(
        functools.partial(_tiled_kernel, normalize=normalize),
        out_shape=jax.ShapeDtypeStruct((B, Mp, D), jnp.float32),
        grid_spec=pltpu.PrefetchScalarGridSpec(
            num_scalar_prefetch=0,
            grid=grid,
            in_specs=[
                pl.BlockSpec((1, tm, tk), lambda b, i, k: (b, i, k)),
                pl.BlockSpec((1, tk, D), lambda b, i, k: (b, k, 0)),
            ],
            out_specs=pl.BlockSpec((1, tm, D), lambda b, i, k: (b, i, 0)),
            scratch_shapes=[pltpu.VMEM((tm, D), jnp.float32),
                            pltpu.VMEM((tm, 1), jnp.float32)],
        ),
        compiler_params=pltpu.CompilerParams(
            dimension_semantics=("parallel", "parallel", "arbitrary"),
            vmem_limit_bytes=vmem_limit),
    )(path, X)
    return out[:, :M, :] if Mp != M else out


def message_agg_ref(X, path, agg_method="mean"):
    """Pure-JAX reference mirroring the PyTorch module."""
    path = path.astype(jnp.float32)
    agg = jnp.einsum("bmn,bnd->bmd", path, X)
    if agg_method == "mean":
        norm = 1.0 / jnp.sum(path, axis=2, keepdims=True)
        norm = jnp.where(jnp.isinf(norm), 0.0, norm)
        return norm * agg
    return agg


if __name__ == "__main__":
    B, M, N, D = 2, 8, 16, 32

    key = jax.random.PRNGKey(0)
    kx, kp = jax.random.split(key)

    X = jax.random.normal(kx, (B, N, D), dtype=jnp.float32)
    # Binary aggregation matrix; one all-zero row per batch element exercises the
    # inf -> 0 normalization path.
    path = (jax.random.uniform(kp, (B, M, N)) < 0.35).astype(jnp.float32)
    path = path.at[:, 0, :].set(0.0)

    # path is 0/1 so the bf16 storage cast is exact and halves path HBM traffic.
    out = jax.block_until_ready(message_agg(X, path, path_dtype=jnp.bfloat16))
    ref = message_agg_ref(X, path)

    assert out.shape == (B, M, D)
    assert jnp.allclose(out, ref, atol=1e-4, rtol=1e-4), "mismatch vs reference"

    print("KERNEL_OK")
</pallas_src>

<mosaic_0001>
module attributes {stable_mosaic.version = 11 : i64} {
  func.func @_batch_kernel(%arg0: i32, %arg1: memref<1x8x16xbf16, #tpu.memory_space<vmem>>, %arg2: memref<1x16x32xf32, #tpu.memory_space<vmem>>, %arg3: memref<1x8x32xf32, #tpu.memory_space<vmem>>) attributes {dimension_semantics = [#tpu.dimension_semantics<parallel>], iteration_bounds = array<i64: 2>, scalar_prefetch = 0 : i64, scratch_operands = 0 : i64, tpu.core_type = #tpu.core_type<tc>, window_params = [{transform_indices = @transform_0, window_bounds = array<i64: 1, 8, 16>}, {transform_indices = @transform_1, window_bounds = array<i64: 1, 16, 32>}, {transform_indices = @transform_2, window_bounds = array<i64: 1, 8, 32>}]} {
    %c0 = arith.constant 0 : index
    %c0_0 = arith.constant 0 : index
    %c0_1 = arith.constant 0 : index
    %0 = vector.load %arg1[%c0, %c0_0, %c0_1] : memref<1x8x16xbf16, #tpu.memory_space<vmem>>, vector<1x8x16xbf16>
    %1 = arith.extf %0 : vector<1x8x16xbf16> to vector<1x8x16xf32>
    %c0_2 = arith.constant 0 : index
    %c0_3 = arith.constant 0 : index
    %c0_4 = arith.constant 0 : index
    %2 = vector.load %arg2[%c0_2, %c0_3, %c0_4] : memref<1x16x32xf32, #tpu.memory_space<vmem>>, vector<1x16x32xf32>
    "tpu.trace_start"() <{level = 10 : i32, message = "bmn,bnd->bmd"}> : () -> ()
    %cst = arith.constant dense<0.000000e+00> : vector<1x8x32xf32>
    %3 = tpu.matmul %1, %2, %cst {dimension_numbers = #tpu.dot_dimension_numbers<[2], [1], [1], [2], [0, 0, 0, 1, 1, 2], [0], [0]>} : vector<1x8x16xf32>, vector<1x16x32xf32>, vector<1x8x32xf32> -> vector<1x8x32xf32>
    "tpu.trace_stop"() : () -> ()
    %cst_5 = arith.constant dense<0.000000e+00> : vector<1x8xf32>
    %4 = vector.multi_reduction <add>, %1, %cst_5 [2] : vector<1x8x16xf32> to vector<1x8xf32>
    %5 = vector.shape_cast %4 : vector<1x8xf32> to vector<1x8x1xf32>
    %cst_6 = arith.constant 1.000000e+00 : f32
    %6 = vector.broadcast %cst_6 : f32 to vector<1x8x1xf32>
    %7 = arith.divf %6, %5 : vector<1x8x1xf32>
    %8 = math.absf %7 : vector<1x8x1xf32>
    %cst_7 = arith.constant 0x7F800000 : f32
    %9 = vector.broadcast %cst_7 : f32 to vector<1x8x1xf32>
    %10 = arith.cmpf oeq, %8, %9 : vector<1x8x1xf32>
    %cst_8 = arith.constant 0.000000e+00 : f32
    %11 = vector.broadcast %cst_8 : f32 to vector<1x8x1xf32>
    %12 = arith.select %10, %11, %7 : vector<1x8x1xi1>, vector<1x8x1xf32>
    %13 = vector.broadcast %12 : vector<1x8x1xf32> to vector<1x8x32xf32>
    %14 = arith.mulf %13, %3 : vector<1x8x32xf32>
    %c0_9 = arith.constant 0 : index
    %c0_10 = arith.constant 0 : index
    %c0_11 = arith.constant 0 : index
    %15 = vector.load %arg3[%c0_9, %c0_10, %c0_11] : memref<1x8x32xf32, #tpu.memory_space<vmem>>, vector<1x8x32xf32>
    tpu.vector_store %arg3[%c0_9, %c0_10, %c0_11], %14 {strides = array<i32>} : memref<1x8x32xf32, #tpu.memory_space<vmem>>, vector<1x8x32xf32>,
    return
  }
  func.func @transform_0(%arg0: i32) -> (i32, i32, i32) {
    %c0_i32 = arith.constant 0 : i32
    %c0_i32_0 = arith.constant 0 : i32
    %c0_i32_1 = arith.constant 0 : i32
    return %arg0, %c0_i32, %c0_i32_0 : i32, i32, i32
  }
  func.func @transform_1(%arg0: i32) -> (i32, i32, i32) {
    %c0_i32 = arith.constant 0 : i32
    %c0_i32_0 = arith.constant 0 : i32
    %c0_i32_1 = arith.constant 0 : i32
    return %arg0, %c0_i32, %c0_i32_0 : i32, i32, i32
  }
  func.func @transform_2(%arg0: i32) -> (i32, i32, i32) {
    %c0_i32 = arith.constant 0 : i32
    %c0_i32_0 = arith.constant 0 : i32
    %c0_i32_1 = arith.constant 0 : i32
    return %arg0, %c0_i32, %c0_i32_0 : i32, i32, i32
  }
}

</mosaic_0001>

<bundles_post_ra>
// kernel: tpu_custom_call.1
= control target key start
LH: loop header
LB: loop body
LE: loop exit
PB: predicated region body
PF: predicated region fallthrough
CT: control target
= control target key end

     0   :  { %7 = vsyncpa [#allocation3], 0  ;;  %s852_s0 = inlined_call_operand.hbm [shape: bf16[2,8,16], index: 0, kind: input, shape index: {}]   ;;  %s853_s1 = inlined_call_operand.hbm [shape: f32[2,16,32], index: 1, kind: input, shape index: {}]   ;;  %s854_s2 = inlined_call_operand.hbm [shape: f32[2,8,32], index: 2, kind: output, shape index: {}]  }
   0x1   :  { %9 = vsyncpa [#allocation3 + $0x1], 0 }
   0x2   :  { %10 = vsyncpa [#allocation6], 0 }
   0x3   :  { %12 = vsyncpa [#allocation6 + $0x1], 0 }
   0x4   :  { %13 = vsyncpa [#allocation4], 0 }
   0x5   :  { %15 = vsyncpa [#allocation4 + $0x1], 0  ;;  %s639_s9 = smov 0   ;;  %s641_s10 = smov 0  }
   0x6   :  { %s643_s11 = smov 0   ;;  %s645_s12 = smov 0  }
   0x7 LB: > { %s660_s13 = sadd.s32 4294967295, %s614_s12   ;;  %s395_s14 = sadd.s32 4294967294, %s614_s12   ;;  %s614_s12 = sphi %s645_s12, %s872_s12   ;;  %s610_s11 = sphi %s643_s11, %s871_s11   ;;  %s606_s10 = sphi %s641_s10, %s870_s10   ;;  %s602_s9 = sphi %s639_s9, %s869_s9  }
   0x8   : > { %s664_s15 = sadd.s32 1, %s614_s12   ;;  %s28_s16 = sadd.s32 1, %s610_s11 }
   0x9   : > { %s25_s17 = ssub.s32 %s614_s12, %s664_s15  ;;  %p35_p0 = scmp.ne.s32.totalorder %s610_s11, %s606_s10 }
   0xa   : > { %p26_p1 = scmp.eq.s32.totalorder %s25_s17, 0  ;;  %p36_p2 = scmp.eq.s32.totalorder %s614_s12, 0 }
   0xb   : > { %p41_p3 = scmp.ne.s32.totalorder %s606_s10, %s602_s9  ;;  %p42_p4 = scmp.eq.s32.totalorder %s660_s13, 0 }
   0xc   : > { %s676_s18 = scalar_select %p26_p1, %s610_s11, %s28_s16  }
   0xd   : > { %p678_p5 = por %p36_p2, %p35_p0  ;;  %p682_p6 = por %p42_p4, %p41_p3 }
   0xe   : > { %p91_p7 = scmp.eq.s32.totalorder %s660_s13, 1  ;;  %p97_p8 = scmp.eq.s32.totalorder %s395_s14, 1 }
   0xf   : > { %s858_s20 = scalar_select %p682_p6, 1, 0 }
  0x10   : > { %p443_p10 = scmp.lt.s32.totalorder %s614_s12, 2  ;;  %p689_p11 = por %p91_p7, %p35_p0 }
  0x11   : > { %p693_p12 = por %p97_p8, %p41_p3  ;;  %s698_s23 = sand.u32 1, %s610_s11  }
  0x12   : > { %s859_s21 = scalar_select %p689_p11, 1, 0 }
  0x13   : > { %s860_s22 = scalar_select %p693_p12, 1, 0 }
  0x14   : > { %s399_s24 = sshll.u32 %s614_s12, 6  ;;  %s398_s25 = sshll.u32 %s698_s23, 2 }
  0x15   : > { %s705_s28 = scalar_lea.hbm %s852_s0, %s399_s24  ;;  %s121_s29 = scalar_lea.vmem [#allocation2], %s398_s25 }
  0x16   : > { %s128_s30 = sshll.u32 %s121_s29, 4  ;;  %p709_p13 = pnand %p443_p10, %p678_p5  ;;  %s713_s30 = int_to_ptr.vmem [resolvable:$true] %s128_s30 }
  0x17   : > { %s118_s4 = scalar_lea.sflag [#allocation3], %s698_s23  ;;  %s484_s5 = scalar_lea.hbm %s705_s28, 64 }
  0x18   : > { %p485_p2 = scmp.ne.s32.totalorder %s705_s28, %s484_s5  ;;  %p486_p3 = pneg %p709_p13 }
  0x19   : > { %s489_s8 = scalar_lea.hbm %s852_s0, 128  ;;  %p490_p5 = scmp.lt.u32.totalorder %s705_s28, %s852_s0 }
  0x1a   : > { %p487_p4 = pnand %p486_p3, %p485_p2  ;;  %p491_p8 = scmp.lt.u32.totalorder %s489_s8, %s484_s5 }
  0x1b   : > { %p493_p9 = scmp.lt.u32.totalorder %s484_s5, %s705_s28 }
  0x1c   : > { %p488_p7 = pneg %p487_p4  ;;  %p492_p10 = por %p491_p8, %p490_p5 }
  0x1e   : > { %p494_p0 = por %p493_p9, %p492_p10 }
  0x20   : > { %p495_p1 = pnand %p494_p0, %p488_p7 }
  0x22   : > { %498 = shalt.err (!%p495_p1)
}
  0x23   : > { %s499_s17 = scalar_lea.vmem %s713_s30, 64  ;;  %s616_s19 = smov [#allocation2]  }
  0x24   : > { %p500_p2 = scmp.ne.s32.totalorder %s713_s30, %s499_s17  ;;  %s504_s24 = sshll.u32 %s616_s19, 4  ;;  %s505_s24 = int_to_ptr.vmem [resolvable:$false] %s504_s24 }
  0x25   : > { %s506_s25 = scalar_lea.vmem %s505_s24, 128  ;;  %p507_p11 = scmp.lt.s32.totalorder %s713_s30, %s505_s24 }
  0x26   : > { %p502_p4 = pnand %p500_p2, %p486_p3  ;;  %p508_p5 = scmp.lt.s32.totalorder %s506_s25, %s499_s17 }
  0x28   : > { %p503_p12 = pneg %p502_p4  ;;  %p509_p8 = por %p508_p5, %p507_p11 }
  0x2a   : > { %p510_p9 = pnand %p509_p8, %p503_p12 }
  0x2c   : > { %513 = shalt.err (!%p510_p9)
}
  0x2d   : > { %435 = dma.hbm_to_vmem [thread:$0]  (!%p709_p13), %s705_s28, 64, %s713_s30, %s118_s4  }
  0x2e   : > { %p862_p0 = scmp.lt.s32.totalorder %s614_s12, 3  ;;  %p863_p1 = scmp.ge.s32.totalorder %s614_s12, 1 }
  0x2f   : > { %s400_s27 = sshll.u32 %s698_s23, 4  ;;  %s412_s29 = sshll.u32 %s614_s12, 8 }
  0x30   : > { %p747_p7 = pnand %p863_p1, %p862_p0  ;;  %s756_s7 = scalar_lea.hbm %s853_s1, %s412_s29 }
  0x31   : > { %s139_s8 = scalar_lea.vmem [#allocation5], %s400_s27  ;;  %s136_s28 = scalar_lea.sflag [#allocation6], %s698_s23 }
  0x32   : > { %s146_s14 = sshll.u32 %s139_s8, 4  ;;  %s514_s30 = scalar_lea.hbm %s756_s7, 256  ;;  %s758_s14 = int_to_ptr.vmem [resolvable:$true] %s146_s14 }
  0x33   : > { %p515_p11 = scmp.ne.s32.totalorder %s756_s7, %s514_s30  ;;  %s519_s17 = scalar_lea.hbm %s853_s1, 512 }
  0x34   : > { %p520_p2 = scmp.lt.u32.totalorder %s756_s7, %s853_s1  ;;  %p521_p4 = scmp.lt.u32.totalorder %s519_s17, %s514_s30 }
  0x35   : > { %p517_p12 = pnand %p515_p11, %p486_p3  ;;  %p523_p8 = scmp.lt.u32.totalorder %s514_s30, %s756_s7 }
  0x36   : > { %p522_p5 = por %p521_p4, %p520_p2 }
  0x37   : > { %p518_p10 = pneg %p517_p12 }
  0x38   : > { %p524_p9 = por %p523_p8, %p522_p5 }
  0x3a   : > { %p525_p0 = pnand %p524_p9, %p518_p10 }
  0x3c   : > { %528 = shalt.err (!%p525_p0)
}
  0x3d   : > { %s529_s25 = scalar_lea.vmem %s758_s14, 256  ;;  %s617_s27 = smov [#allocation5]  }
  0x3e   : > { %p530_p1 = scmp.ne.s32.totalorder %s758_s14, %s529_s25  ;;  %s534_s29 = sshll.u32 %s617_s27, 4  ;;  %s535_s29 = int_to_ptr.vmem [resolvable:$false] %s534_s29 }
  0x3f   : > { %s536_s5 = scalar_lea.vmem %s535_s29, 512  ;;  %p537_p6 = scmp.lt.s32.totalorder %s758_s14, %s535_s29 }
  0x40   : > { %p532_p11 = pnand %p530_p1, %p486_p3  ;;  %p538_p2 = scmp.lt.s32.totalorder %s536_s5, %s529_s25 }
  0x42   : > { %p533_p12 = pneg %p532_p11  ;;  %p539_p4 = por %p538_p2, %p537_p6 }
  0x44   : > { %p540_p5 = pnand %p539_p4, %p533_p12 }
  0x46   : > { %543 = shalt.err (!%p540_p5)
}
  0x47   : > { %s618_s6 = smov 128   ;;  %s619_s8 = smov 8  }
  0x48   : > { %438 = dma.hbm_to_vmem [thread:$0]  (!%p709_p13), %s756_s7, 256, %s758_s14, %s136_s28, %s618_s6, %s618_s6, %s619_s8  }
  0x49   : > { %158 = sbr.rel (%p747_p7) target bundleno = 318 (0x13e), region = 28  ;;  %s789_s30 = sand.u32 (!%p747_p7), 1, %s606_s10  }
  0x4a   : > { %s404_s4 = sshll.u32 (!%p747_p7), %s789_s30, 2  ;;  %s161_s16 = scalar_lea.sflag (!%p747_p7), [#allocation3], %s789_s30 }
  0x4b   : > { %s164_s17 = scalar_lea.vmem (!%p747_p7), [#allocation2], %s404_s4  ;;  %p865_p6 = scmp.ne.s32.totalorder (!%p747_p7), %s858_s20, 0 }
  0x50   : > { %589 = dma.done.wait (%p865_p6), %s161_s16, 64  }
  0x51   : > { %591 = vsyncadd (%p865_p6), %s161_s16, 4294967232  ;;  %s405_s23 = sshll.u32 %s789_s30, 4  ;;  %s170_s3 = scalar_lea.sflag [#allocation6], %s789_s30 }
  0x52   : > { %s173_s26 = scalar_lea.vmem [#allocation5], %s405_s23 }
  0x53   : > { %593 = dma.done.wait (%p865_p6), %s170_s3, 256  }
  0x54   : > { %595 = vsyncadd (%p865_p6), %s170_s3, 4294967040  ;;  %v620_v0 = vmov 0.0|0.0   ;;  %vm621_vm0 = vmmov 0   ;;  %v622_v1 = vmov 0.0   ;;  %v201_v2 = vld [vmem:[%s173_s26] sm:$0xff]  ;;  %v202_v3 = vld [vmem:[%s173_s26 + $0x8] sm:$0xff] }
  0x55   : > { %423 = vmatprep.subr.bf16.mxu0 %v620_v0  ;;  %420 = vmatprep.mubr.msk.f32.mxu0 %vm621_vm0, %v622_v1  ;;  %v199_v4 = vld [vmem:[%s164_s17] sm:$0xf]  ;;  %v424_v5 = vpack.c.bf16 %v202_v3, %v201_v2  ;;  %vm203_vm1 = vcmask 130048   ;;  %s406_s20 = sshll.u32 %s789_s30, 3  ;;  %s409_s7 = sshll.u32 %s660_s13, 7  ;;  %vm286_vm3 = vcmask 261120  }
  0x56   : > { %v200_v6 = vunpack.c.l.bf16 %v199_v4  ;;  %s198_s14 = scalar_lea.vmem [#allocation7], %s406_s20  ;;  %s808_s25 = scalar_lea.hbm %s854_s2, %s409_s7 }
  0x57   : > { %425 = vmatpush3.bf16.msra.mxu0 %v424_v5  ;;  %s302_s28 = sshll.u32 %s198_s14, 4  ;;  %s289_s27 = scalar_lea.sflag [#allocation4], %s789_s30  ;;  %s810_s28 = int_to_ptr.vmem [resolvable:$true] %s302_s28 }
  0x58   : > { %v277_v7 = vsel %vm203_vm1, %v200_v6, 0.0  ;;  %s544_s13 = scalar_lea.vmem %s810_s28, 128  ;;  %p866_p3 = scmp.ne.s32.totalorder %s859_s21, 0 }
  0x59   : > { %278 = vadd.xlane.f32.xlu0 %v277_v7  ;;  %p545_p13 = scmp.ne.s32.totalorder %s810_s28, %s544_s13  ;;  %s623_s29 = smov [#allocation7]  }
  0x5a   : > { %421 = vmatmul.mubr.msk.f32.vlgmr.msra.gmra.mrb[0].mxu0 %vm203_vm1, %v200_v6  ;;  %s548_s5 = sshll.u32 %s623_s29, 4  ;;  %s549_s5 = int_to_ptr.vmem [resolvable:$false] %s548_s5 }
  0x5b   : > { %p546_p7 = pnand %p545_p13, %p866_p3  ;;  %s550_s6 = scalar_lea.vmem %s549_s5, 256 }
  0x5c   : > { %p551_p8 = scmp.lt.s32.totalorder %s810_s28, %s549_s5  ;;  %p552_p9 = scmp.lt.s32.totalorder %s550_s6, %s544_s13 }
  0x5d   : > { %p547_p10 = pneg %p546_p7 }
  0x5e   : > { %p553_p0 = por %p552_p9, %p551_p8 }
  0x60   : > { %p554_p1 = pnand %p553_p0, %p547_p10 }
  0xe6   : > { %v279_v8 = vpop.xlane.xlu0 %278 }
  0xe7   : > { %482 = vrcp.f32 %v279_v8 }
  0xf1   : > { %v483_v9 = vpop.eup %482 }
  0xf2   : > { %v282_v10 = vand.u32 2147483647, %v483_v9 }
  0xf4   : > { %vm283_vm2 = vcmp.eq.f32.partialorder %v282_v10, inf }
  0xf5   : > { %v284_v12 = vsel %vm283_vm2, 0.0, %v483_v9 }
 0x12d   : > { %v273_v11 = vpop.f32.mrb[0].mxu0 }
 0x12e   : > { %v285_v13 = vmul.f32 %v284_v12, %v273_v11  ;;  %v422_v14 = vpop.f32.mrb[1].mxu0 }
 0x130   : > { %287 = vst.msk [vmem:[%s198_s14] sm:$0xff] %vm286_vm3, %v285_v13 }
 0x131   : > { %557 = shalt.err (!%p554_p1)
}
 0x132   : > { %s558_s8 = scalar_lea.hbm %s808_s25, 128  ;;  %s562_s16 = scalar_lea.hbm %s854_s2, 256 }
 0x133   : > { %p559_p11 = scmp.ne.s32.totalorder %s808_s25, %s558_s8  ;;  %p563_p4 = scmp.lt.u32.totalorder %s808_s25, %s854_s2 }
 0x134   : > { %p564_p5 = scmp.lt.u32.totalorder %s562_s16, %s558_s8  ;;  %p566_p13 = scmp.lt.u32.totalorder %s558_s8, %s808_s25 }
 0x135   : > { %p560_p12 = pnand %p559_p11, %p866_p3 }
 0x136   : > { %p565_p6 = por %p564_p5, %p563_p4 }
 0x137   : > { %p561_p2 = pneg %p560_p12 }
 0x138   : > { %p567_p7 = por %p566_p13, %p565_p6 }
 0x13a   : > { %p568_p10 = pnand %p567_p7, %p561_p2 }
 0x13c   : > { %571 = shalt.err (!%p568_p10)
}
 0x13d   : > { %430 = dma.vmem_to_hbm [thread:$0]  (%p866_p3), %s810_s28, 128, %s808_s25, %s289_s27  }
 0x13e PF: > { %s314_s3 = sand.u32 1, %s602_s9   ;;  %p867_p8 = scmp.ne.s32.totalorder %s860_s22, 0 }
 0x13f   : > { %p868_p9 = scmp.ge.s32.totalorder %s614_s12, 2  ;;  %s315_s26 = scalar_lea.sflag [#allocation4], %s314_s3 }
 0x141   : > { %p440_p0 = pnand %p868_p9, %p867_p8 }
 0x143   : > { %597 = dma.done.wait (!%p440_p0), %s315_s26, 128  }
 0x144   : > { %599 = vsyncadd (!%p440_p0), %s315_s26, 4294967168  ;;  %p18_p1 = scmp.ge.s32.totalorder %s664_s15, 4   ;;  %s869_s9 = smov %s606_s10 }
 0x145   : > { %s870_s10 = smov %s610_s11  ;;  %s871_s11 = smov %s676_s18 }
 0x146   : > { %s872_s12 = smov %s664_s15  ;;  %20 = sbr.rel (!%p18_p1) target bundleno = 7 (0x7), region = 86 }
 0x14d   :  { %320 = vsyncpa [#allocation3], 1 }
 0x14e   :  { %322 = vsyncpa [#allocation3 + $0x1], 1 }
 0x14f   :  { %323 = vsyncpa [#allocation6], 1 }
 0x150   :  { %325 = vsyncpa [#allocation6 + $0x1], 1 }
 0x151   :  { %326 = vsyncpa [#allocation4], 1 }
 0x152   :  { %328 = vsyncpa [#allocation4 + $0x1], 1 }

</bundles_post_ra>
